<compile_context>
chip_gen: v7x
topology: tpu7x:2x2x1
jax: 0.10.0
libtpu: 0.0.40
codegen_flags: <defaults>
</compile_context>

<pallas_src>
import functools

import jax
import jax.numpy as jnp
from jax.experimental import pallas as pl
from jax.experimental.pallas import tpu as pltpu


def _round_up(a, b):
    return -(-a // b) * b


def _round_down(a, b):
    return (a // b) * b


def _int_pow(x, n):
    """x**n for a static integer n >= 1, unrolled square-and-multiply (VPU only)."""
    result = None
    base = x
    while n > 0:
        if n & 1:
            result = base if result is None else result * base
        n >>= 1
        if n:
            base = base * base
    return result


def _pow_p(x, p, p_is_int):
    if p_is_int:
        return _int_pow(x, int(round(p)))
    return x ** p


def _root_p(m, p, p_is_int):
    if p_is_int and int(round(p)) == 1:
        return m
    return m ** (1.0 / p)


def _gem_kernel_single(x_ref, o_ref, *, p, p_is_int, eps, inv_count):
    # One (row_tile, HW) block: clamp -> pow -> lane reduce -> mean -> root.
    x = x_ref[...].astype(jnp.float32)
    x = jnp.maximum(x, eps)
    xp = _pow_p(x, p, p_is_int)
    m = jnp.sum(xp, axis=-1, keepdims=True) * inv_count
    o_ref[...] = _root_p(m, p, p_is_int).astype(o_ref.dtype)


def _gem_kernel_chunked(x_ref, o_ref, acc_ref, *, p, p_is_int, eps, inv_count,
                        num_k, last_valid, ragged):
    k = pl.program_id(1)

    @pl.when(k == 0)
    def _init():
        acc_ref[...] = jnp.zeros_like(acc_ref)

    x = x_ref[...].astype(jnp.float32)
    x = jnp.maximum(x, eps)
    xp = _pow_p(x, p, p_is_int)

    if ragged:
        # Mask only the ragged final spatial chunk; steady-state chunks are
        # clamp + pow + reduce with no per-element select.
        @pl.when(k < num_k - 1)
        def _full_chunk():
            acc_ref[...] += jnp.sum(xp, axis=-1, keepdims=True)

        @pl.when(k == num_k - 1)
        def _last_chunk():
            lane = jax.lax.broadcasted_iota(jnp.int32, xp.shape, xp.ndim - 1)
            xm = jnp.where(lane < last_valid, xp, 0.0)
            acc_ref[...] += jnp.sum(xm, axis=-1, keepdims=True)
    else:
        acc_ref[...] += jnp.sum(xp, axis=-1, keepdims=True)

    @pl.when(k == num_k - 1)
    def _finalize():
        m = acc_ref[...] * inv_count
        o_ref[...] = _root_p(m, p, p_is_int).astype(o_ref.dtype)


def _vmem_cap_bytes():
    """~75% of physical VMEM (48 MiB on v7x, ~96 MiB on v5e/v6e)."""
    phys = 64 << 20  # conservative fallback (v7x-sized)
    try:
        info = pltpu.get_tpu_info()
        for attr in ("vmem_capacity_bytes", "vmem_size_bytes", "vmem_bytes"):
            v = getattr(info, attr, None)
            if v:
                phys = int(v)
                break
    except Exception:
        pass
    return (phys * 3) // 4


def gem(x, p=3.0, eps=1e-6, *, target_block_bytes=4 << 20):
    """x: (N, C, H, W) float array -> (N, C, 1, 1)."""
    N, C, H, W = x.shape
    HW = H * W
    rows = N * C
    p = float(p)
    eps = float(eps)
    p_int = int(round(p))
    p_is_int = abs(p - p_int) < 1e-12 and p_int >= 1
    itemsize = jnp.dtype(x.dtype).itemsize
    target = int(target_block_bytes)

    # Free, contiguous reshape: no HBM round-trip, blocks are contiguous slabs.
    x2d = x.reshape(rows, HW)

    lane_pad_hw = _round_up(HW, 128)          # in-VMEM lane padding of a full row
    min_rows = rows if rows < 8 else 8

    if min_rows * lane_pad_hw * itemsize <= target:
        # ---- single spatial chunk: block last dim == true HW (exempt) -------
        hw_chunk = HW
        num_k = 1
        lane_pad_block = lane_pad_hw
        if rows < 8:
            row_tile = rows                    # equals full dim -> exempt
        else:
            row_tile = max(8, _round_down(target // (lane_pad_block * itemsize), 8))
            row_tile = min(row_tile, max(8, _round_down(rows, 8)))
            if rows >= 16:
                # Megacore: keep >= 2 iterations on the "parallel" axis.
                row_tile = min(row_tile, _round_up(-(-rows // 2), 8))
    else:
        # ---- huge feature map: chunk the spatial (lane) axis -----------------
        row_tile = rows if rows < 8 else 8
        hw_chunk = _round_down(target // (max(row_tile, 1) * itemsize), 128)
        hw_chunk = max(512, min(hw_chunk, _round_down(HW, 128)))
        num_k = -(-HW // hw_chunk)
        lane_pad_block = hw_chunk

    num_i = -(-rows // row_tile)
    ragged = (HW % hw_chunk) != 0
    last_valid = HW - (num_k - 1) * hw_chunk
    inv_count = 1.0 / float(HW)

    # VMEM budget: double-buffered input block (lane-padded in VMEM) plus
    # fused f32 temporaries; capped at ~75% of this generation's physical VMEM.
    row_pad = _round_up(max(row_tile, 1), 8)
    block_in_vmem = row_pad * lane_pad_block * itemsize
    block_f32 = row_pad * lane_pad_block * 4
    vmem_need = 2 * block_in_vmem + 2 * block_f32 + (2 << 20)
    vmem_limit = int(min(max(vmem_need, 32 << 20), _vmem_cap_bytes()))

    cost = pl.CostEstimate(
        flops=4 * rows * HW,  # clamp + 2 mul + add per element (p=3 path)
        transcendentals=0 if (p_is_int and p_int == 1) else rows,
        bytes_accessed=rows * HW * itemsize + rows * itemsize,
    )

    out_shape = jax.ShapeDtypeStruct((rows, 1), x.dtype)

    if num_k == 1:
        kernel = functools.partial(
            _gem_kernel_single, p=p, p_is_int=p_is_int, eps=eps,
            inv_count=inv_count)
        grid_spec = pltpu.PrefetchScalarGridSpec(
            num_scalar_prefetch=0,
            grid=(num_i,),
            in_specs=[pl.BlockSpec((row_tile, HW), lambda i: (i, 0))],
            out_specs=pl.BlockSpec((row_tile, 1), lambda i: (i, 0)),
        )
        dims = ("parallel",)
    else:
        kernel = functools.partial(
            _gem_kernel_chunked, p=p, p_is_int=p_is_int, eps=eps,
            inv_count=inv_count, num_k=num_k, last_valid=last_valid,
            ragged=ragged)
        grid_spec = pltpu.PrefetchScalarGridSpec(
            num_scalar_prefetch=0,
            grid=(num_i, num_k),
            in_specs=[pl.BlockSpec((row_tile, hw_chunk), lambda i, k: (i, k))],
            out_specs=pl.BlockSpec((row_tile, 1), lambda i, k: (i, 0)),
            scratch_shapes=[pltpu.VMEM((row_tile, 1), jnp.float32)],
        )
        dims = ("parallel", "arbitrary")

    out = pl.pallas_call(
        kernel,
        out_shape=out_shape,
        grid_spec=grid_spec,
        compiler_params=pltpu.CompilerParams(
            dimension_semantics=dims,
            vmem_limit_bytes=vmem_limit,
        ),
        cost_estimate=cost,
    )(x2d)

    return out.reshape(N, C, 1, 1)


class GeM:
    """Mirror of the PyTorch module (p_trainable=False default)."""

    def __init__(self, p=3, eps=1e-6, p_trainable=False):
        # TODO(synk): p_trainable=True would make p a learned scalar; here it
        # stays a static Python float (deterministic init, matches default).
        self.p = float(p)
        self.eps = float(eps)

    def __call__(self, x):
        return gem(x, p=self.p, eps=self.eps)


def _gem_ref(x, p=3.0, eps=1e-6):
    xc = jnp.maximum(x, eps)
    return jnp.mean(xc ** p, axis=(-2, -1), keepdims=True) ** (1.0 / p)


if __name__ == "__main__":
    mod = GeM(p=3, eps=1e-6)

    # Primary small test matching the module spec (single-chunk fast path).
    x = jax.random.normal(jax.random.PRNGKey(0), (2, 4, 16, 16), dtype=jnp.float32)
    out = jax.block_until_ready(mod(x))
    ref = _gem_ref(x, p=3.0, eps=1e-6)
    assert out.shape == (2, 4, 1, 1), out.shape
    assert jnp.allclose(out, ref, atol=1e-5, rtol=1e-5), (
        float(jnp.max(jnp.abs(out - ref)))
    )

    # Force the chunked path: ragged final spatial chunk + accumulator + rows<8.
    x2 = jax.random.normal(jax.random.PRNGKey(0), (2, 3, 48, 48), dtype=jnp.float32)
    out2 = jax.block_until_ready(gem(x2, p=3.0, eps=1e-6, target_block_bytes=16384))
    ref2 = _gem_ref(x2, p=3.0, eps=1e-6)
    assert out2.shape == (2, 3, 1, 1), out2.shape
    assert jnp.allclose(out2, ref2, atol=1e-5, rtol=1e-5), (
        float(jnp.max(jnp.abs(out2 - ref2)))
    )

    # Non-multiple-of-8 rows and HW not a multiple of 128 (single-chunk,
    # partial final row block handled by Pallas OOB masking on write).
    x3 = jax.random.normal(jax.random.PRNGKey(0), (3, 5, 7, 7), dtype=jnp.float32)
    out3 = jax.block_until_ready(gem(x3, p=3.0, eps=1e-6))
    ref3 = _gem_ref(x3, p=3.0, eps=1e-6)
    assert out3.shape == (3, 5, 1, 1), out3.shape
    assert jnp.allclose(out3, ref3, atol=1e-5, rtol=1e-5), (
        float(jnp.max(jnp.abs(out3 - ref3)))
    )

    print("KERNEL_OK")
</pallas_src>

<mosaic_0001>
module attributes {stable_mosaic.version = 11 : i64} {
  func.func @_gem_kernel_single(%arg0: i32, %arg1: memref<8x256xf32, #tpu.memory_space<vmem>>, %arg2: memref<8x1xf32, #tpu.memory_space<vmem>>) attributes {dimension_semantics = [#tpu.dimension_semantics<parallel>], iteration_bounds = array<i64: 1>, scalar_prefetch = 0 : i64, scratch_operands = 0 : i64, tpu.core_type = #tpu.core_type<tc>, window_params = [{transform_indices = @transform_0, window_bounds = array<i64: 8, 256>}, {transform_indices = @transform_1, window_bounds = array<i64: 8, 1>}]} {
    %c0 = arith.constant 0 : index
    %c0_0 = arith.constant 0 : index
    %0 = vector.load %arg1[%c0, %c0_0] : memref<8x256xf32, #tpu.memory_space<vmem>>, vector<8x256xf32>
    %cst = arith.constant 9.99999997E-7 : f32
    %1 = vector.broadcast %cst : f32 to vector<8x256xf32>
    %2 = arith.maximumf %0, %1 : vector<8x256xf32>
    %3 = arith.mulf %2, %2 : vector<8x256xf32>
    %4 = arith.mulf %2, %3 : vector<8x256xf32>
    %cst_1 = arith.constant dense<0.000000e+00> : vector<8xf32>
    %5 = vector.multi_reduction <add>, %4, %cst_1 [1] : vector<8x256xf32> to vector<8xf32>
    %6 = vector.shape_cast %5 : vector<8xf32> to vector<8x1xf32>
    %cst_2 = arith.constant 3.906250e-03 : f32
    %7 = vector.broadcast %cst_2 : f32 to vector<8x1xf32>
    %8 = arith.mulf %6, %7 : vector<8x1xf32>
    %cst_3 = arith.constant 0.333333343 : f32
    %9 = vector.broadcast %cst_3 : f32 to vector<8x1xf32>
    %10 = math.powf %8, %9 : vector<8x1xf32>
    %c0_4 = arith.constant 0 : index
    %c0_5 = arith.constant 0 : index
    %11 = vector.load %arg2[%c0_4, %c0_5] : memref<8x1xf32, #tpu.memory_space<vmem>>, vector<8x1xf32>
    tpu.vector_store %arg2[%c0_4, %c0_5], %10 {strides = array<i32>} : memref<8x1xf32, #tpu.memory_space<vmem>>, vector<8x1xf32>,
    return
  }
  func.func @transform_0(%arg0: i32) -> (i32, i32) {
    %c0_i32 = arith.constant 0 : i32
    %c0_i32_0 = arith.constant 0 : i32
    return %arg0, %c0_i32 : i32, i32
  }
  func.func @transform_1(%arg0: i32) -> (i32, i32) {
    %c0_i32 = arith.constant 0 : i32
    %c0_i32_0 = arith.constant 0 : i32
    return %arg0, %c0_i32 : i32, i32
  }
}

</mosaic_0001>

<bundles_post_ra>
// kernel: tpu_custom_call.1
= control target key start
LH: loop header
LB: loop body
LE: loop exit
PB: predicated region body
PF: predicated region fallthrough
CT: control target
= control target key end

     0   :  { %6 = vsyncpa [#allocation3], 0  ;;  %s87_s6 = smov [#allocation2]   ;;  %s113_s0 = inlined_call_operand.hbm [shape: f32[8,256], index: 0, kind: input, shape index: {}]   ;;  %s114_s1 = inlined_call_operand.vmem [shape: f32[8,1], index: 1, kind: output, shape index: {}]  }
   0x1   :  { %s13_s7 = sshll.u32 %s87_s6, 4  ;;  %s63_s10 = scalar_lea.hbm %s113_s0, 256  ;;  %s14_s7 = int_to_ptr.vmem [resolvable:$true] %s13_s7 }
   0x2   :  { %p64_p0 = scmp.ne.s32.totalorder %s113_s0, %s63_s10  ;;  %p67_p1 = scmp.lt.u32.totalorder %s63_s10, %s113_s0 }
   0x4   :  { %p69_p2 = pnand %p67_p1, %p64_p0 }
   0x6   :  { %72 = shalt.err (!%p69_p2)
}
   0x7   :  { %s73_s15 = scalar_lea.vmem %s14_s7, 256  ;;  %p78_p4 = scmp.lt.s32.totalorder %s14_s7, %s14_s7 }
   0x8   :  { %p74_p3 = scmp.ne.s32.totalorder %s14_s7, %s73_s15  ;;  %p79_p5 = scmp.lt.s32.totalorder %s73_s15, %s73_s15 }
   0xa   :  { %p80_p6 = por %p79_p5, %p78_p4 }
   0xc   :  { %p81_p7 = pnand %p80_p6, %p74_p3 }
   0xe   :  { %84 = shalt.err (!%p81_p7)
}
   0xf   :  { %16 = dma.hbm_to_vmem [thread:$0]  %s113_s0, 256, %s14_s7, [#allocation3]  }
  0x10   :  { %85 = dma.done.wait [#allocation3], 256  }
  0x11   :  { %86 = vsyncadd [#allocation3], 4294967040  ;;  %v20_v0 = vld [vmem:[#allocation2] sm:$0xff]  ;;  %v21_v1 = vld [vmem:[#allocation2 + $0x8] sm:$0xff]  ;;  %vm33_vm4 = vcmask 7168  }
  0x12   :  { %v22_v2 = vmax.f32 %v20_v0, 1e-06  ;;  %v23_v3 = vmax.f32 %v21_v1, 1e-06 }
  0x14   :  { %v24_v4 = vmul.f32 %v22_v2, %v22_v2  ;;  %v25_v5 = vmul.f32 %v23_v3, %v23_v3 }
  0x16   :  { %v26_v6 = vmul.f32 %v24_v4, %v22_v2  ;;  %v27_v7 = vmul.f32 %v25_v5, %v23_v3 }
  0x18   :  { %v28_v8 = vadd.f32 %v27_v7, %v26_v6 }
  0x1a   :  { %29 = vadd.xlane.f32.xlu0 %v28_v8 }
  0xa7   :  { %v30_v9 = vpop.xlane.xlu0 %29 }
  0xa8   :  { %v31_v10 = vmul.f32 0.00390625, %v30_v9 }
  0xaa   :  { %v42_v11 = vand.u32 2147483647, %v31_v10  ;;  %v46_v14 = vand.u32 2147483648, %v31_v10  ;;  %vm41_vm2 = vcmp.lt.f32.partialorder %v31_v10, 0.0  ;;  %vm40_vm3 = vcmp.eq.f32.partialorder %v31_v10, 0.0 }
  0xac   :  { %59 = vlog2.f32 %v42_v11  ;;  %vm50_vm0 = vweird.f32 %v42_v11  ;;  %vm52_vm1 = vcmp.eq.f32.partialorder %v42_v11, 0.0  ;;  %vm43_vm5 = vcmp.eq.f32.partialorder %v42_v11, inf }
  0xb6   :  { %v60_v12 = vpop.eup %59 }
  0xb7   :  { %v47_v13 = vmul.f32 0.33333334, %v60_v12 }
  0xb9   :  { %61 = vpow2.f32 %v47_v13 }
  0xc3   :  { %v62_v15 = vpop.eup %61 }
  0xc4   :  { %v49_v16 = vor.u32 %v62_v15, %v46_v14 }
  0xc6   :  { %v51_v17 = vsel %vm50_vm0, %v31_v10, %v49_v16 }
  0xc7   :  { %v54_v18 = vsel %vm52_vm1, %v46_v14, %v51_v17 }
  0xc8   :  { %v55_v19 = vsel %vm41_vm2, nan, %v54_v18 }
  0xc9   :  { %v56_v20 = vsel %vm40_vm3, 0.0, %v55_v19 }
  0xca   :  { %v57_v21 = vsel %vm43_vm5, inf, %v56_v20 }
  0xcb   :  { %34 = vst.msk [vmem:[%s114_s1] sm:$0xff] %vm33_vm4, %v57_v21 }
  0xcc   :  { %39 = vsyncpa [#allocation3], 1 }

</bundles_post_ra>
